<compile_context>
chip_gen: v7x
topology: tpu7x:2x2x1
jax: 0.10.0
libtpu: 0.0.40
codegen_flags: <defaults>
</compile_context>

<pallas_src>
import jax
import jax.numpy as jnp
import numpy as np
from jax.experimental import pallas as pl
from jax.experimental.pallas import tpu as pltpu


_NEG = -1e30  # finite "minus infinity" for masking invalid time steps


def _round_up(x, m):
    return (x + m - 1) // m * m


def _cnn_fused_kernel(x_ref, wconv_ref, biasmask_ref, fcw_ref, fcb_ref, out_ref):
    """One batch tile: im2col -> fused conv matmul -> bias/mask -> ReLU ->
    max-over-time -> FC, all lane-dense."""
    TB, L, E = x_ref.shape
    KE, F_PAD = wconv_ref.shape
    kmax = KE // E
    N = TB * L

    # (TB, L, E) -> (N, E).  Cast to f32 for the sublane rotations (32-bit rows
    # keep Mosaic on the plain rotate path); the MXU still consumes bf16 below.
    x2d = x_ref[...].astype(jnp.float32).reshape(N, E)

    # im2col along the channel axis via XLU sublane rotations (no unaligned
    # sublane slices): slab[r, tau*E:(tau+1)*E] = x2d[(r + tau) % N].
    # Rows whose window crosses a sample boundary (or the tile end) wrap
    # around, but those time steps are masked to -1e30 in biasmask, so the
    # wraparound never reaches the max-over-time.
    taps = [x2d] + [pltpu.roll(x2d, shift=N - tau, axis=0) for tau in range(1, kmax)]
    slab = jnp.concatenate(taps, axis=-1).astype(wconv_ref.dtype)      # (N, kmax*E)

    # One fused MXU matmul over all taps AND all filter widths, f32 accumulate.
    acc = jnp.dot(slab, wconv_ref[...], preferred_element_type=jnp.float32)  # (N, F_PAD)

    # bias + validity mask, ReLU, max over time.
    # NOTE: at this tile size the full (TB, L, F_PAD) f32 activation is ~64 KiB,
    # so a running max over an L-tiled loop is unnecessary; revisit for huge L.
    acc = acc.reshape(TB, L, F_PAD) + biasmask_ref[...][None, :, :]
    pooled = jnp.max(jnp.maximum(acc, 0.0), axis=1)                    # (TB, F_PAD)

    # Classifier head: lane-dense (TB, OUT_PAD) store.
    logits = jnp.dot(pooled.astype(fcw_ref.dtype), fcw_ref[...],
                     preferred_element_type=jnp.float32) + fcb_ref[...]
    out_ref[...] = logits.astype(out_ref.dtype)


def _pack_params(conv_ws, conv_bs, fc_w, fc_b, filter_sizes, seq_len):
    """Pack per-filter conv weights into one fused, lane-padded operand set.

    w_fused   (kmax*E, F_PAD) bf16 : tap-major fused conv weight (zero taps for
                                     filters shorter than kmax, zero pad cols).
    bias_mask (L, F_PAD)      f32  : conv bias at valid time steps, -1e30 at
                                     invalid steps (per-filter L_out) / pad cols.
    fc_w_pad  (F_PAD, OUT_PAD) bf16, fc_b_pad (1, OUT_PAD) f32.
    """
    E = int(conv_ws[0].shape[1])
    F = int(conv_ws[0].shape[2])
    n_conv = len(filter_sizes)
    kmax = max(filter_sizes)
    f_total = n_conv * F
    f_pad = _round_up(f_total, 128)
    out_dim = int(fc_w.shape[-1])
    out_pad = _round_up(out_dim, 128)

    w_fused = np.zeros((kmax * E, f_pad), np.float32)
    bias_mask = np.full((seq_len, f_pad), _NEG, np.float32)
    for i, (k, w, b) in enumerate(zip(filter_sizes, conv_ws, conv_bs)):
        w_np = np.asarray(w, np.float32)          # (k, E, F)
        b_np = np.asarray(b, np.float32)          # (1, F)
        for tau in range(k):
            w_fused[tau * E:(tau + 1) * E, i * F:(i + 1) * F] = w_np[tau]
        l_out = seq_len - k + 1                   # valid output positions
        bias_mask[:l_out, i * F:(i + 1) * F] = b_np[0][None, :]

    fc_w_pad = np.zeros((f_pad, out_pad), np.float32)
    fc_w_pad[:f_total, :out_dim] = np.asarray(fc_w, np.float32)
    fc_b_pad = np.zeros((1, out_pad), np.float32)
    fc_b_pad[:, :out_dim] = np.asarray(fc_b, np.float32)

    return (jnp.asarray(w_fused, jnp.bfloat16),
            jnp.asarray(bias_mask, jnp.float32),
            jnp.asarray(fc_w_pad, jnp.bfloat16),
            jnp.asarray(fc_b_pad, jnp.float32),
            kmax, f_pad, out_pad)


def cnn_forward(ids, emb_table, conv_ws, conv_bs, fc_w, fc_b, filter_sizes):
    B, L = ids.shape
    E = int(emb_table.shape[-1])
    out_dim = int(fc_w.shape[-1])
    assert L >= max(filter_sizes), "sequence shorter than the widest filter"

    # TODO(synk): for large vocab/E, move this gather into the kernel
    # (PrefetchScalarGridSpec scalar-prefetched ids + per-row DMA from the
    # HBM-resident table) to avoid the HBM round trip of the (B, L, E) tensor.
    # nn.Dropout is the identity in eval/inference mode.
    x = emb_table[ids].astype(jnp.bfloat16)                        # (B, L, E)

    w_fused, bias_mask, fc_w_p, fc_b_p, kmax, f_pad, out_pad = _pack_params(
        conv_ws, conv_bs, fc_w, fc_b, filter_sizes, L)

    # Batch grid: TB rows per step (multiple of 8 for sublane alignment); pad
    # the batch so it divides evenly — padded rows are sliced away below.
    tb = min(128, _round_up(B, 8))
    b_pad = _round_up(B, tb)
    if b_pad != B:
        x = jnp.pad(x, ((0, b_pad - B), (0, 0), (0, 0)))

    out = pl.pallas_call(
        _cnn_fused_kernel,
        out_shape=jax.ShapeDtypeStruct((b_pad, out_pad), jnp.float32),
        grid_spec=pltpu.PrefetchScalarGridSpec(
            num_scalar_prefetch=0,
            grid=(b_pad // tb,),
            in_specs=[
                pl.BlockSpec((tb, L, E), lambda i: (i, 0, 0)),      # activations
                pl.BlockSpec((kmax * E, f_pad), lambda i: (0, 0)),  # fused conv W
                pl.BlockSpec((L, f_pad), lambda i: (0, 0)),         # bias + mask
                pl.BlockSpec((f_pad, out_pad), lambda i: (0, 0)),   # fc W
                pl.BlockSpec((1, out_pad), lambda i: (0, 0)),       # fc b
            ],
            out_specs=pl.BlockSpec((tb, out_pad), lambda i: (i, 0)),
        ),
        compiler_params=pltpu.CompilerParams(
            dimension_semantics=("parallel",),        # batch tiles independent
            # Explicit scoped-VMEM budget, safe on v7x (64 MiB physical,
            # 32 MiB default scoped) as well as v5e/v6e.
            vmem_limit_bytes=32 * 1024 * 1024,
        ),
    )(x, w_fused, bias_mask, fc_w_p, fc_b_p)

    return out[:B, :out_dim]


def cnn_reference(ids, emb_table, conv_ws, conv_bs, fc_w, fc_b, filter_sizes):
    """Pure-JAX f32 reference with PyTorch eval-mode semantics."""
    x = emb_table[ids]                                             # (B, L, E)
    B, L, _ = x.shape
    pooled = []
    for k, w, b in zip(filter_sizes, conv_ws, conv_bs):
        l_out = L - k + 1
        acc = jnp.zeros((B, l_out, w.shape[-1]), jnp.float32)
        for tau in range(k):
            acc = acc + jnp.einsum('ble,ef->blf', x[:, tau:tau + l_out, :], w[tau])
        acc = jnp.maximum(acc + b[None, :, :], 0.0)
        pooled.append(jnp.max(acc, axis=1))
    cat = jnp.concatenate(pooled, axis=-1)
    return cat @ fc_w + fc_b


if __name__ == "__main__":
    # Module hyper-parameters (small, consistent with the PyTorch __init__).
    vocab_size = 32
    embedding_dim = 32
    n_filters = 16
    filter_sizes = (3, 4, 5)
    output_dim = 4
    pad_index = 0
    batch, seq_len = 2, 16

    key = jax.random.PRNGKey(0)
    k_emb, k_ids, k_fc, *k_convs = jax.random.split(key, 3 + len(filter_sizes))

    # Deterministic synthetic parameters (no checkpoint).
    emb_table = 0.1 * jax.random.normal(k_emb, (vocab_size, embedding_dim),
                                        jnp.float32)
    emb_table = emb_table.at[pad_index].set(0.0)            # padding_idx row = 0

    conv_ws, conv_bs = [], []
    for kc, fs in zip(k_convs, filter_sizes):
        kw, kb = jax.random.split(kc)
        # PyTorch Conv1d weight is (F, E, k); stored here as (k, E, F).
        conv_ws.append(0.1 * jax.random.normal(kw, (fs, embedding_dim, n_filters),
                                               jnp.float32))
        conv_bs.append(0.1 * jax.random.normal(kb, (1, n_filters), jnp.float32))

    kfw, kfb = jax.random.split(k_fc)
    # PyTorch Linear weight is (out, in); stored here as its transpose (in, out).
    fc_w = 0.1 * jax.random.normal(kfw, (len(filter_sizes) * n_filters, output_dim),
                                   jnp.float32)
    fc_b = 0.1 * jax.random.normal(kfb, (1, output_dim), jnp.float32)

    ids = jax.random.randint(k_ids, (batch, seq_len), 0, vocab_size, jnp.int32)

    out = cnn_forward(ids, emb_table, conv_ws, conv_bs, fc_w, fc_b, filter_sizes)
    out = jax.block_until_ready(out)

    ref = cnn_reference(ids, emb_table, conv_ws, conv_bs, fc_w, fc_b, filter_sizes)
    # bf16 MXU inputs vs. f32 reference -> loose-ish tolerance.
    np.testing.assert_allclose(np.asarray(out), np.asarray(ref),
                               rtol=2e-2, atol=2e-2)
    assert out.shape == (batch, output_dim)
    print("KERNEL_OK")
</pallas_src>

<mosaic_0001>
module attributes {stable_mosaic.version = 11 : i64} {
  func.func @_cnn_fused_kernel(%arg0: i32, %arg1: memref<8x16x32xbf16, #tpu.memory_space<vmem>>, %arg2: memref<160x128xbf16, #tpu.memory_space<vmem>>, %arg3: memref<16x128xf32, #tpu.memory_space<vmem>>, %arg4: memref<128x128xbf16, #tpu.memory_space<vmem>>, %arg5: memref<1x128xf32, #tpu.memory_space<vmem>>, %arg6: memref<8x128xf32, #tpu.memory_space<vmem>>) attributes {dimension_semantics = [#tpu.dimension_semantics<parallel>], iteration_bounds = array<i64: 1>, scalar_prefetch = 0 : i64, scratch_operands = 0 : i64, tpu.core_type = #tpu.core_type<tc>, window_params = [{transform_indices = @transform_0, window_bounds = array<i64: 8, 16, 32>}, {pipeline_mode = #tpu.pipeline_mode<synchronous>, transform_indices = @transform_1, window_bounds = array<i64: 160, 128>}, {pipeline_mode = #tpu.pipeline_mode<synchronous>, transform_indices = @transform_2, window_bounds = array<i64: 16, 128>}, {pipeline_mode = #tpu.pipeline_mode<synchronous>, transform_indices = @transform_3, window_bounds = array<i64: 128, 128>}, {pipeline_mode = #tpu.pipeline_mode<synchronous>, transform_indices = @transform_4, window_bounds = array<i64: 1, 128>}, {transform_indices = @transform_5, window_bounds = array<i64: 8, 128>}]} {
    %c0 = arith.constant 0 : index
    %c0_0 = arith.constant 0 : index
    %c0_1 = arith.constant 0 : index
    %0 = vector.load %arg1[%c0, %c0_0, %c0_1] : memref<8x16x32xbf16, #tpu.memory_space<vmem>>, vector<8x16x32xbf16>
    %1 = arith.extf %0 : vector<8x16x32xbf16> to vector<8x16x32xf32>
    %2 = vector.shape_cast %1 : vector<8x16x32xf32> to vector<128x32xf32>
    %c127_i32 = arith.constant 127 : i32
    %3 = tpu.dynamic_rotate %2 by %c127_i32 dim 0 : vector<128x32xf32>, i32 -> vector<128x32xf32>
    %c126_i32 = arith.constant 126 : i32
    %4 = tpu.dynamic_rotate %2 by %c126_i32 dim 0 : vector<128x32xf32>, i32 -> vector<128x32xf32>
    %c125_i32 = arith.constant 125 : i32
    %5 = tpu.dynamic_rotate %2 by %c125_i32 dim 0 : vector<128x32xf32>, i32 -> vector<128x32xf32>
    %c124_i32 = arith.constant 124 : i32
    %6 = tpu.dynamic_rotate %2 by %c124_i32 dim 0 : vector<128x32xf32>, i32 -> vector<128x32xf32>
    %7 = tpu.concatenate %2, %3, %4, %5, %6 in 1 : vector<128x32xf32>, vector<128x32xf32>, vector<128x32xf32>, vector<128x32xf32>, vector<128x32xf32> -> vector<128x160xf32>
    %8 = arith.truncf %7 : vector<128x160xf32> to vector<128x160xbf16>
    %c0_2 = arith.constant 0 : index
    %c0_3 = arith.constant 0 : index
    %9 = vector.load %arg2[%c0_2, %c0_3] : memref<160x128xbf16, #tpu.memory_space<vmem>>, vector<160x128xbf16>
    %cst = arith.constant dense<0.000000e+00> : vector<128x128xf32>
    %10 = tpu.matmul %8, %9, %cst {dimension_numbers = #tpu.dot_dimension_numbers<[1], [0], [0], [1], [0, 0, 1, 1], [], []>} : vector<128x160xbf16>, vector<160x128xbf16>, vector<128x128xf32> -> vector<128x128xf32>
    %11 = vector.shape_cast %10 : vector<128x128xf32> to vector<8x16x128xf32>
    %c0_4 = arith.constant 0 : index
    %c0_5 = arith.constant 0 : index
    %12 = vector.load %arg3[%c0_4, %c0_5] : memref<16x128xf32, #tpu.memory_space<vmem>>, vector<16x128xf32>
    %13 = vector.shape_cast %12 : vector<16x128xf32> to vector<1x16x128xf32>
    %14 = vector.broadcast %13 : vector<1x16x128xf32> to vector<8x16x128xf32>
    %15 = arith.addf %11, %14 : vector<8x16x128xf32>
    %cst_6 = arith.constant 0.000000e+00 : f32
    %16 = vector.broadcast %cst_6 : f32 to vector<8x16x128xf32>
    %17 = arith.maximumf %15, %16 : vector<8x16x128xf32>
    %cst_7 = arith.constant dense<0xFF800000> : vector<8x128xf32>
    %18 = vector.multi_reduction <maximumf>, %17, %cst_7 [1] : vector<8x16x128xf32> to vector<8x128xf32>
    %19 = arith.truncf %18 : vector<8x128xf32> to vector<8x128xbf16>
    %c0_8 = arith.constant 0 : index
    %c0_9 = arith.constant 0 : index
    %20 = vector.load %arg4[%c0_8, %c0_9] : memref<128x128xbf16, #tpu.memory_space<vmem>>, vector<128x128xbf16>
    %cst_10 = arith.constant dense<0.000000e+00> : vector<8x128xf32>
    %21 = tpu.matmul %19, %20, %cst_10 {dimension_numbers = #tpu.dot_dimension_numbers<[1], [0], [0], [1], [0, 0, 1, 1], [], []>} : vector<8x128xbf16>, vector<128x128xbf16>, vector<8x128xf32> -> vector<8x128xf32>
    %c0_11 = arith.constant 0 : index
    %c0_12 = arith.constant 0 : index
    %22 = vector.load %arg5[%c0_11, %c0_12] : memref<1x128xf32, #tpu.memory_space<vmem>>, vector<1x128xf32>
    %23 = vector.broadcast %22 : vector<1x128xf32> to vector<8x128xf32>
    %24 = arith.addf %21, %23 : vector<8x128xf32>
    %c0_13 = arith.constant 0 : index
    %c0_14 = arith.constant 0 : index
    %25 = vector.load %arg6[%c0_13, %c0_14] : memref<8x128xf32, #tpu.memory_space<vmem>>, vector<8x128xf32>
    tpu.vector_store %arg6[%c0_13, %c0_14], %24 {strides = array<i32>} : memref<8x128xf32, #tpu.memory_space<vmem>>, vector<8x128xf32>,
    return
  }
  func.func @transform_0(%arg0: i32) -> (i32, i32, i32) {
    %c0_i32 = arith.constant 0 : i32
    %c0_i32_0 = arith.constant 0 : i32
    %c0_i32_1 = arith.constant 0 : i32
    return %arg0, %c0_i32, %c0_i32_0 : i32, i32, i32
  }
  func.func @transform_1(%arg0: i32) -> (i32, i32) {
    %c0_i32 = arith.constant 0 : i32
    %c0_i32_0 = arith.constant 0 : i32
    %c0_i32_1 = arith.constant 0 : i32
    return %c0_i32, %c0_i32_0 : i32, i32
  }
  func.func @transform_2(%arg0: i32) -> (i32, i32) {
    %c0_i32 = arith.constant 0 : i32
    %c0_i32_0 = arith.constant 0 : i32
    %c0_i32_1 = arith.constant 0 : i32
    return %c0_i32, %c0_i32_0 : i32, i32
  }
  func.func @transform_3(%arg0: i32) -> (i32, i32) {
    %c0_i32 = arith.constant 0 : i32
    %c0_i32_0 = arith.constant 0 : i32
    %c0_i32_1 = arith.constant 0 : i32
    return %c0_i32, %c0_i32_0 : i32, i32
  }
  func.func @transform_4(%arg0: i32) -> (i32, i32) {
    %c0_i32 = arith.constant 0 : i32
    %c0_i32_0 = arith.constant 0 : i32
    %c0_i32_1 = arith.constant 0 : i32
    return %c0_i32, %c0_i32_0 : i32, i32
  }
  func.func @transform_5(%arg0: i32) -> (i32, i32) {
    %c0_i32 = arith.constant 0 : i32
    %c0_i32_0 = arith.constant 0 : i32
    return %arg0, %c0_i32 : i32, i32
  }
}

</mosaic_0001>

<bundles_post_ra>
// kernel: tpu_custom_call.1
= control target key start
LH: loop header
LB: loop body
LE: loop exit
PB: predicated region body
PF: predicated region fallthrough
CT: control target
= control target key end

     0   :  { %10 = vsyncpa [#allocation3], 0  ;;  %s1848_s0 = inlined_call_operand.hbm [shape: bf16[8,16,32], index: 0, kind: input, shape index: {}]   ;;  %s1849_s1 = inlined_call_operand.hbm [shape: bf16[160,128], index: 1, kind: input, shape index: {}]   ;;  %s1850_s2 = inlined_call_operand.hbm [shape: f32[16,128], index: 2, kind: input, shape index: {}]   ;;  %s1851_s3 = inlined_call_operand.hbm [shape: bf16[128,128], index: 3, kind: input, shape index: {}]   ;;  %s1852_s4 = inlined_call_operand.vmem [shape: f32[1,128], index: 4, kind: input, shape index: {}]   ;;  %s1853_s5 = inlined_call_operand.hbm [shape: f32[8,128], index: 5, kind: output, shape index: {}]  }
   0x1   :  { %11 = vsyncpa [#allocation6], 0 }
   0x2   :  { %12 = vsyncpa [#allocation9], 0 }
   0x3   :  { %13 = vsyncpa [#allocation4], 0  ;;  %s1327_s18 = smov [#allocation5]   ;;  %s1328_s20 = smov [#allocation2]  }
   0x4   :  { %s31_s19 = sshll.u32 %s1327_s18, 4  ;;  %s19_s21 = sshll.u32 %s1328_s20, 4  ;;  %s32_s19 = int_to_ptr.vmem [resolvable:$true] %s31_s19  ;;  %s1371_s21 = int_to_ptr.vmem [resolvable:$true] %s19_s21 }
   0x5   :  { %s1209_s24 = scalar_lea.hbm %s1849_s1, 1280 }
   0x6   :  { %p1210_p0 = scmp.ne.s32.totalorder %s1849_s1, %s1209_s24  ;;  %p1213_p1 = scmp.lt.u32.totalorder %s1209_s24, %s1849_s1 }
   0x8   :  { %p1215_p2 = pnand %p1213_p1, %p1210_p0 }
   0xa   :  { %1218 = shalt.err (!%p1215_p2)
}
   0xb   :  { %s1219_s29 = scalar_lea.vmem %s32_s19, 1280  ;;  %p1224_p4 = scmp.lt.s32.totalorder %s32_s19, %s32_s19 }
   0xc   :  { %p1220_p3 = scmp.ne.s32.totalorder %s32_s19, %s1219_s29  ;;  %p1225_p5 = scmp.lt.s32.totalorder %s1219_s29, %s1219_s29 }
   0xe   :  { %p1226_p6 = por %p1225_p5, %p1224_p4 }
  0x10   :  { %p1227_p7 = pnand %p1226_p6, %p1220_p3 }
  0x12   :  { %1230 = shalt.err (!%p1227_p7)
}
  0x13   :  { %s1329_s30 = smov 64   ;;  %s1330_s6 = smov 4  }
  0x14   :  { %37 = dma.hbm_to_vmem [thread:$0]  %s1849_s1, 1280, %s32_s19, [#allocation6], %s1329_s30, %s1329_s30, %s1330_s6  }
  0x15   :  { %s1231_s11 = scalar_lea.hbm %s1848_s0, 1024 }
  0x16   :  { %p1232_p8 = scmp.ne.s32.totalorder %s1848_s0, %s1231_s11  ;;  %p1235_p9 = scmp.lt.u32.totalorder %s1231_s11, %s1848_s0 }
  0x18   :  { %p1237_p10 = pnand %p1235_p9, %p1232_p8 }
  0x1a   :  { %1240 = shalt.err (!%p1237_p10)
}
  0x1b   :  { %s1241_s16 = scalar_lea.vmem %s1371_s21, 1024  ;;  %p1246_p12 = scmp.lt.s32.totalorder %s1371_s21, %s1371_s21 }
  0x1c   :  { %p1242_p11 = scmp.ne.s32.totalorder %s1371_s21, %s1241_s16  ;;  %p1247_p13 = scmp.lt.s32.totalorder %s1241_s16, %s1241_s16 }
  0x1e   :  { %p1248_p0 = por %p1247_p13, %p1246_p12 }
  0x20   :  { %p1249_p1 = pnand %p1248_p0, %p1242_p11 }
  0x22   :  { %1252 = shalt.err (!%p1249_p1)
}
  0x23   :  { %25 = dma.hbm_to_vmem [thread:$0]  %s1848_s0, 1024, %s1371_s21, [#allocation3], %s1329_s30, %s1329_s30, %s1330_s6  }
  0x24   :  { %s1331_s18 = smov [#allocation7]   ;;  %s1253_s23 = scalar_lea.hbm %s1850_s2, 256 }
  0x25   :  { %s43_s19 = sshll.u32 %s1331_s18, 4  ;;  %p1254_p2 = scmp.ne.s32.totalorder %s1850_s2, %s1253_s23  ;;  %s44_s19 = int_to_ptr.vmem [resolvable:$true] %s43_s19 }
  0x26   :  { %p1257_p3 = scmp.lt.u32.totalorder %s1253_s23, %s1850_s2 }
  0x28   :  { %p1259_p4 = pnand %p1257_p3, %p1254_p2 }
  0x2a   :  { %1262 = shalt.err (!%p1259_p4)
}
  0x2b   :  { %s1263_s28 = scalar_lea.vmem %s44_s19, 256  ;;  %p1268_p6 = scmp.lt.s32.totalorder %s44_s19, %s44_s19 }
  0x2c   :  { %p1264_p5 = scmp.ne.s32.totalorder %s44_s19, %s1263_s28  ;;  %p1269_p7 = scmp.lt.s32.totalorder %s1263_s28, %s1263_s28 }
  0x2e   :  { %p1270_p8 = por %p1269_p7, %p1268_p6 }
  0x30   :  { %p1271_p9 = pnand %p1270_p8, %p1264_p5 }
  0x32   :  { %1274 = shalt.err (!%p1271_p9)
}
  0x33   :  { %s1332_s0 = smov 128   ;;  %s1333_s21 = smov 8  }
  0x34   :  { %49 = dma.hbm_to_vmem [thread:$0]  %s1850_s2, 256, %s44_s19, [#allocation6], %s1332_s0, %s1332_s0, %s1333_s21  }
  0x35   :  { %s1334_s8 = smov [#allocation8]   ;;  %s1275_s12 = scalar_lea.hbm %s1851_s3, 1024 }
  0x36   :  { %s55_s9 = sshll.u32 %s1334_s8, 4  ;;  %p1276_p10 = scmp.ne.s32.totalorder %s1851_s3, %s1275_s12  ;;  %s56_s9 = int_to_ptr.vmem [resolvable:$true] %s55_s9 }
  0x37   :  { %p1279_p11 = scmp.lt.u32.totalorder %s1275_s12, %s1851_s3 }
  0x39   :  { %p1281_p12 = pnand %p1279_p11, %p1276_p10 }
  0x3b   :  { %1284 = shalt.err (!%p1281_p12)
}
  0x3c   :  { %s1285_s1 = scalar_lea.vmem %s56_s9, 1024  ;;  %p1290_p0 = scmp.lt.s32.totalorder %s56_s9, %s56_s9 }
  0x3d   :  { %p1286_p13 = scmp.ne.s32.totalorder %s56_s9, %s1285_s1  ;;  %p1291_p1 = scmp.lt.s32.totalorder %s1285_s1, %s1285_s1 }
  0x3f   :  { %p1292_p2 = por %p1291_p1, %p1290_p0 }
  0x41   :  { %p1293_p3 = pnand %p1292_p2, %p1286_p13 }
  0x43   :  { %1296 = shalt.err (!%p1293_p3)
}
  0x44   :  { %61 = dma.hbm_to_vmem [thread:$0]  %s1851_s3, 1024, %s56_s9, [#allocation9], %s1329_s30, %s1329_s30, %s1330_s6  }
  0x45   :  { %1319 = dma.done.wait [#allocation3], 1024  }
  0x46   :  { %1320 = vsyncadd [#allocation3], 4294966272 }
  0x47   :  { %1321 = dma.done.wait [#allocation6], 1536  }
  0x48   :  { %1322 = vsyncadd [#allocation6], 4294965760 }
  0x49   :  { %1323 = dma.done.wait [#allocation9], 1024  }
  0x4a   :  { %1324 = vsyncadd [#allocation9], 4294966272  ;;  %v125_v0 = vlaneseq  ;;  %v1335_v1 = vmov 0   ;;  %v990_v3 = vld [vmem:[#allocation2] sm:$0xff]   ;;  %v1021_v4 = vld [vmem:[#allocation2 + $0x8] sm:$0xff]   ;;  %s1336_s3 = smov 32  }
  0x4b   :  { %606 = vmatprep.subr.bf16.mxu0 %v1335_v1  ;;  %v1022_v5 = vld [vmem:[#allocation2 + $0x10] sm:$0xff]   ;;  %v1441_v6 = vunpack.c.l.bf16 %v990_v3  ;;  %v1443_v7 = vunpack.c.h.bf16 %v990_v3  ;;  %v1445_v8 = vunpack.c.l.bf16 %v1021_v4  ;;  %v1447_v9 = vunpack.c.h.bf16 %v1021_v4  ;;  %v1023_v10 = vld [vmem:[#allocation2 + $0x18] sm:$0xff]   ;;  %v1191_v23 = vld [vmem:[#allocation5] sm:$0xff]   ;;  %s1337_s6 = smov 96   ;;  %s1340_s19 = smov [#allocation10]  }
  0x4c   :  { %v1436_v2 = vshrl.u32 %v125_v0, 7  ;;  %v1449_v11 = vunpack.c.l.bf16 %v1022_v5  ;;  %v1451_v12 = vunpack.c.h.bf16 %v1022_v5  ;;  %v1453_v13 = vunpack.c.l.bf16 %v1023_v10  ;;  %607 = vmatpush1.bf16.msra.mxu0 %v1191_v23  ;;  %v1192_v32 = vld [vmem:[#allocation5 + $0x8] sm:$0xff]   ;;  %v1024_v41 = vld [vmem:[#allocation2 + $0x20] sm:$0xff]   ;;  %v1193_v46 = vld [vmem:[#allocation5 + $0x10] sm:$0xff]   ;;  %s951_s20 = sshll.u32 %s1340_s19, 4  ;;  %s952_s20 = int_to_ptr.vmem [resolvable:$true] %s951_s20 }
  0x4d   :  { %v1455_v14 = vunpack.c.h.bf16 %v1023_v10  ;;  %v109_v15 = vrot.slane %v1441_v6, 1  ;;  %v110_v16 = vrot.slane %v1443_v7, 1  ;;  %v111_v17 = vrot.slane %v1445_v8, 1  ;;  %608 = vmatprep.subr.bf16.mxu0 %v1335_v1  ;;  %v1194_v0 = vld [vmem:[#allocation5 + $0x18] sm:$0xff]   ;;  %v1025_v5 = vld [vmem:[#allocation2 + $0x28] sm:$0xff]   ;;  %s1297_s22 = scalar_lea.vmem %s952_s20, 128  ;;  %p1302_p5 = scmp.lt.s32.totalorder %s952_s20, %s952_s20 }
  0x4e   :  { %vm127_vm0 = vcmp.lt.s32.totalorder %v1436_v2, 7  ;;  %vm193_vm1 = vcmp.lt.s32.totalorder %v1436_v2, 5  ;;  %vm160_vm2 = vcmp.lt.s32.totalorder %v1436_v2, 6  ;;  %v177_v18 = vrot.slane %v1441_v6, 3  ;;  %p1298_p4 = scmp.ne.s32.totalorder %s952_s20, %s1297_s22  ;;  %p1303_p6 = scmp.lt.s32.totalorder %s1297_s22, %s1297_s22 }
  0x4f   :  { %v178_v19 = vrot.slane %v1443_v7, 3  ;;  %v179_v20 = vrot.slane %v1445_v8, 3  ;;  %v144_v21 = vrot.slane %v1441_v6, 2  ;;  %v145_v22 = vrot.slane %v1443_v7, 2 }
  0x50   :  { %v141_v24 = vsel %vm127_vm0, %v110_v16, %v111_v17  ;;  %v142_v25 = vsel %vm127_vm0, %v109_v15, %v110_v16  ;;  %v146_v26 = vrot.slane %v1445_v8, 2  ;;  %v112_v27 = vrot.slane %v1447_v9, 1  ;;  %609 = vmatpush1.bf16.msra.mxu0 %v1192_v32  ;;  %p1304_p7 = por %p1303_p6, %p1302_p5 }
  0x51   :  { %v1071_v28 = vpack.i.bf16 %v141_v24, %v142_v25  ;;  %v207_v29 = vsel %vm193_vm1, %v178_v19, %v179_v20  ;;  %v208_v30 = vsel %vm193_vm1, %v177_v18, %v178_v19  ;;  %v175_v31 = vsel %vm160_vm2, %v144_v21, %v145_v22  ;;  %610 = vmatprep.subr.bf16.mxu0 %v1335_v1 }
  0x52   :  { %v1081_v33 = vpack.i.bf16 %v207_v29, %v208_v30  ;;  %v174_v34 = vsel %vm160_vm2, %v145_v22, %v146_v26  ;;  %v113_v35 = vrot.slane %v1449_v11, 1  ;;  %v140_v36 = vsel %vm127_vm0, %v111_v17, %v112_v27  ;;  %v1195_v22 = vld [vmem:[#allocation5 + $0x20] sm:$0xff]   ;;  %p1305_p8 = pnand %p1304_p7, %p1298_p4 }
  0x53   :  { %1072 = vrot.lane.b32.xlu0 %v1071_v28, %s1336_s3  ;;  %v1076_v37 = vpack.i.bf16 %v174_v34, %v175_v31  ;;  %v147_v38 = vrot.slane %v1447_v9, 2  ;;  %v148_v39 = vrot.slane %v1449_v11, 2  ;;  %v180_v40 = vrot.slane %v1447_v9, 3 }
  0x54   :  { %1082 = vrot.lane.b32.xlu1 %v1081_v33, %s1337_s6  ;;  %v139_v42 = vsel %vm127_vm0, %v112_v27, %v113_v35  ;;  %v181_v43 = vrot.slane %v1449_v11, 3  ;;  %v114_v44 = vrot.slane %v1451_v12, 1  ;;  %v115_v45 = vrot.slane %v1453_v13, 1  ;;  %611 = vmatpush1.bf16.msra.mxu0 %v1193_v46 }
  0x55   :  { %v1086_v47 = vpack.i.bf16 %v139_v42, %v140_v36  ;;  %v172_v48 = vsel %vm160_vm2, %v147_v38, %v148_v39  ;;  %v173_v49 = vsel %vm160_vm2, %v146_v26, %v147_v38  ;;  %v206_v50 = vsel %vm193_vm1, %v179_v20, %v180_v40  ;;  %612 = vmatprep.subr.bf16.mxu0 %v1335_v1  ;;  %v1026_v20 = vld [vmem:[#allocation2 + $0x30] sm:$0xff]  }
  0x56   :  { %v1091_v51 = vpack.i.bf16 %v172_v48, %v173_v49  ;;  %v205_v52 = vsel %vm193_vm1, %v180_v40, %v181_v43  ;;  %v137_v53 = vsel %vm127_vm0, %v114_v44, %v115_v45  ;;  %v138_v54 = vsel %vm127_vm0, %v113_v35, %v114_v44 }
  0x57   :  { %1077 = vrot.lane.b32.xlu0 %v1076_v37, %s1329_s30  ;;  %v149_v55 = vrot.slane %v1451_v12, 2  ;;  %v150_v56 = vrot.slane %v1453_v13, 2  ;;  %v1096_v57 = vpack.i.bf16 %v205_v52, %v206_v50  ;;  %v182_v58 = vrot.slane %v1451_v12, 3 }
  0x58   :  { %1087 = vrot.lane.b32.xlu1 %v1086_v47, %s1336_s3  ;;  %v183_v59 = vrot.slane %v1453_v13, 3  ;;  %v1518_v60 = vunpack.c.l.bf16 %v1024_v41  ;;  %v116_v63 = vrot.slane %v1455_v14, 1  ;;  %v1101_v3 = vpack.i.bf16 %v137_v53, %v138_v54  ;;  %613 = vmatpush1.bf16.msra.mxu0 %v1194_v0 }
  0x59   :  { %v170_v61 = vsel %vm160_vm2, %v149_v55, %v150_v56  ;;  %v171_v62 = vsel %vm160_vm2, %v148_v39, %v149_v55  ;;  %v151_v17 = vrot.slane %v1455_v14, 2  ;;  %v184_v19 = vrot.slane %v1455_v14, 3  ;;  %614 = vmatprep.subr.bf16.mxu0 %v1335_v1  ;;  %v1196_v39 = vld [vmem:[#allocation5 + $0x28] sm:$0xff]   ;;  %v1027_v55 = vld [vmem:[#allocation2 + $0x38] sm:$0xff]  }
  0x5a   :  { %v117_v4 = vrot.slane %v1518_v60, 1  ;;  %v1106_v10 = vpack.i.bf16 %v170_v61, %v171_v62  ;;  %v203_v16 = vsel %vm193_vm1, %v182_v58, %v183_v59  ;;  %v204_v23 = vsel %vm193_vm1, %v181_v43, %v182_v58 }
  0x5b   :  { %1092 = vrot.lane.b32.xlu0 %v1091_v51, %s1329_s30  ;;  %v152_v24 = vrot.slane %v1518_v60, 2  ;;  %v185_v25 = vrot.slane %v1518_v60, 3  ;;  %v1537_v26 = vunpack.c.h.bf16 %v1024_v41  ;;  %v136_v28 = vsel %vm127_vm0, %v115_v45, %v116_v63 }
  0x5c   :  { %1097 = vrot.lane.b32.xlu1 %v1096_v57, %s1337_s6  ;;  %v135_v27 = vsel %vm127_vm0, %v116_v63, %v117_v4  ;;  %v1543_v29 = vunpack.c.l.bf16 %v1025_v5  ;;  %v1111_v31 = vpack.i.bf16 %v203_v16, %v204_v23  ;;  %v169_v32 = vsel %vm160_vm2, %v150_v56, %v151_v17  ;;  %615 = vmatpush1.bf16.msra.mxu0 %v1195_v22  ;;  %v1197_v56 = vld [vmem:[#allocation5 + $0x30] sm:$0xff]  }
  0x5d   :  { %v118_v30 = vrot.slane %v1537_v26, 1  ;;  %v1551_v34 = vunpack.c.h.bf16 %v1025_v5  ;;  %v1116_v35 = vpack.i.bf16 %v135_v27, %v136_v28  ;;  %v168_v36 = vsel %vm160_vm2, %v151_v17, %v152_v24  ;;  %616 = vmatprep.subr.bf16.mxu0 %v1335_v1 }
  0x5e   :  { %v119_v33 = vrot.slane %v1543_v29, 1  ;;  %v153_v37 = vrot.slane %v1537_v26, 2  ;;  %v1557_v38 = vunpack.c.l.bf16 %v1026_v20  ;;  %v201_v40 = vsel %vm193_vm1, %v184_v19, %v185_v25 }
  0x5f   :  { %1102 = vrot.lane.b32.xlu0 %v1101_v3, %s1336_s3  ;;  %v202_v41 = vsel %vm193_vm1, %v183_v59, %v184_v19  ;;  %v154_v42 = vrot.slane %v1543_v29, 2  ;;  %v186_v43 = vrot.slane %v1537_v26, 3  ;;  %v134_v45 = vsel %vm127_vm0, %v117_v4, %v118_v30 }
  0x60   :  { %1107 = vrot.lane.b32.xlu1 %v1106_v10, %s1329_s30  ;;  %v133_v44 = vsel %vm127_vm0, %v118_v30, %v119_v33  ;;  %v187_v46 = vrot.slane %v1543_v29, 3  ;;  %v1121_v47 = vpack.i.bf16 %v168_v36, %v169_v32  ;;  %v120_v48 = vrot.slane %v1551_v34, 1  ;;  %617 = vmatpush1.bf16.msra.mxu0 %v1196_v39  ;;  %v1198_v10 = vld [vmem:[#allocation5 + $0x38] sm:$0xff]   ;;  %v1199_v36 = vld [vmem:[#allocation5 + $0x40] sm:$0xff]  }
  0x61   :  { %v121_v49 = vrot.slane %v1557_v38, 1  ;;  %v1126_v50 = vpack.i.bf16 %v201_v40, %v202_v41  ;;  %v1131_v51 = vpack.i.bf16 %v133_v44, %v134_v45  ;;  %v166_v52 = vsel %vm160_vm2, %v153_v37, %v154_v42  ;;  %618 = vmatprep.subr.bf16.mxu0 %v1335_v1 }
  0x62   :  { %v167_v53 = vsel %vm160_vm2, %v152_v24, %v153_v37  ;;  %v200_v54 = vsel %vm193_vm1, %v185_v25, %v186_v43  ;;  %v199_v57 = vsel %vm193_vm1, %v186_v43, %v187_v46  ;;  %v155_v58 = vrot.slane %v1551_v34, 2 }
  0x63   :  { %1112 = vrot.lane.b32.xlu0 %v1111_v31, %s1337_s6  ;;  %v156_v59 = vrot.slane %v1557_v38, 2  ;;  %v1585_v61 = vunpack.c.h.bf16 %v1026_v20  ;;  %v131_v62 = vsel %vm127_vm0, %v120_v48, %v121_v49  ;;  %v132_v63 = vsel %vm127_vm0, %v119_v33, %v120_v48 }
  0x64   :  { %1117 = vrot.lane.b32.xlu1 %v1116_v35, %s1336_s3  ;;  %v188_v0 = vrot.slane %v1551_v34, 3  ;;  %v189_v3 = vrot.slane %v1557_v38, 3  ;;  %v1136_v4 = vpack.i.bf16 %v166_v52, %v167_v53  ;;  %v1596_v5 = vunpack.c.l.bf16 %v1027_v55  ;;  %619 = vmatpush1.bf16.msra.mxu0 %v1197_v56  ;;  %v1200_v52 = vld [vmem:[#allocation5 + $0x48] sm:$0xff]  }
  0x65   :  { %vm226_vm3 = vcmp.lt.s32.totalorder %v1436_v2, 4  ;;  %v1141_v16 = vpack.i.bf16 %v199_v57, %v200_v54  ;;  %v1146_v17 = vpack.i.bf16 %v131_v62, %v132_v63  ;;  %v164_v19 = vsel %vm160_vm2, %v155_v58, %v156_v59  ;;  %620 = vmatprep.subr.bf16.mxu0 %v1335_v1 }
  0x66   :  { %v122_v20 = vrot.slane %v1585_v61, 1  ;;  %v165_v22 = vsel %vm160_vm2, %v154_v42, %v155_v58  ;;  %v197_v23 = vsel %vm193_vm1, %v188_v0, %v189_v3  ;;  %v198_v24 = vsel %vm193_vm1, %v187_v46, %v188_v0 }
  0x67   :  { %1122 = vrot.lane.b32.xlu0 %v1121_v47, %s1329_s30  ;;  %v210_v25 = vrot.slane %v1441_v6, 4  ;;  %v123_v27 = vrot.slane %v1596_v5, 1  ;;  %v211_v28 = vrot.slane %v1443_v7, 4  ;;  %v212_v30 = vrot.slane %v1445_v8, 4 }
  0x68   :  { %1127 = vrot.lane.b32.xlu1 %v1126_v50, %s1337_s6  ;;  %v213_v31 = vrot.slane %v1447_v9, 4  ;;  %v157_v32 = vrot.slane %v1585_v61, 2  ;;  %v158_v33 = vrot.slane %v1596_v5, 2  ;;  %v1618_v35 = vunpack.c.h.bf16 %v1027_v55  ;;  %621 = vmatpush1.bf16.msra.mxu0 %v1198_v10 }
  0x69   :  { %v1151_v37 = vpack.i.bf16 %v164_v19, %v165_v22  ;;  %v1156_v39 = vpack.i.bf16 %v197_v23, %v198_v24  ;;  %v130_v40 = vsel %vm127_vm0, %v121_v49, %v122_v20  ;;  %vm435_vm4 = vcmask 261120   ;;  %622 = vmatprep.subr.bf16.mxu0 %v1335_v1 }
  0x6a   :  { %v190_v41 = vrot.slane %v1585_v61, 3  ;;  %v240_v42 = vsel %vm226_vm3, %v211_v28, %v212_v30  ;;  %v241_v43 = vsel %vm226_vm3, %v210_v25, %v211_v28  ;;  %v214_v44 = vrot.slane %v1449_v11, 4 }
  0x6b   :  { %1132 = vrot.lane.b32.xlu0 %v1131_v51, %s1336_s3  ;;  %v129_v45 = vsel %vm127_vm0, %v122_v20, %v123_v27  ;;  %v191_v46 = vrot.slane %v1596_v5, 3  ;;  %v487_v47 = vpack.c.bf16 %v240_v42, %v241_v43  ;;  %v1638_v48 = vsel %vm226_vm3, %v212_v30, %v213_v31 }
  0x6c   :  { %1137 = vrot.lane.b32.xlu1 %v1136_v4, %s1329_s30  ;;  %v162_v49 = vsel %vm160_vm2, %v157_v32, %v158_v33  ;;  %v163_v50 = vsel %vm160_vm2, %v156_v59, %v157_v32  ;;  %v124_v51 = vrot.slane %v1618_v35, 1  ;;  %623 = vmatpush1.bf16.msra.mxu0 %v1199_v36  ;;  %v1649_v53 = vsel %vm226_vm3, %v213_v31, %v214_v44 }
  0x6d   :  { %624 = vmatprep.subr.bf16.mxu0 %v1335_v1  ;;  %972 = vmatprep.mubr.msk.bf16.mxu0 %vm435_vm4, %v487_v47  ;;  %v489_v54 = vpack.c.bf16 %v1649_v53, %v1638_v48  ;;  %v1161_v55 = vpack.i.bf16 %v129_v45, %v130_v40  ;;  %v1166_v56 = vpack.i.bf16 %v162_v49, %v163_v50  ;;  %v159_v59 = vrot.slane %v1618_v35, 2 }
  0x6e   :  { %v195_v57 = vsel %vm193_vm1, %v190_v41, %v191_v46  ;;  %v196_v58 = vsel %vm193_vm1, %v189_v3, %v190_v41  ;;  %v128_v1 = vsel %vm127_vm0, %v123_v27, %v124_v51  ;;  %v143_v62 = vsel %vm127_vm0, %v124_v51, %v109_v15 }
  0x6f   :  { %1142 = vrot.lane.b32.xlu0 %v1141_v16, %s1337_s6  ;;  %v192_v63 = vrot.slane %v1618_v35, 3  ;;  %v1171_v0 = vpack.i.bf16 %v195_v57, %v196_v58  ;;  %v1176_v4 = vpack.i.bf16 %v143_v62, %v128_v1  ;;  %v161_v3 = vsel %vm160_vm2, %v158_v33, %v159_v59 }
  0x70   :  { %1147 = vrot.lane.b32.xlu1 %v1146_v17, %s1336_s3  ;;  %625 = vmatpush1.bf16.msra.mxu0 %v1200_v52  ;;  %v176_v10 = vsel %vm160_vm2, %v159_v59, %v144_v21  ;;  %v224_v21 = vrot.slane %v1596_v5, 4  ;;  %v225_v20 = vrot.slane %v1618_v35, 4  ;;  %vm452_vm5 = vcmask 523264  }
  0x71   :  { %v194_v15 = vsel %vm193_vm1, %v191_v46, %v192_v63  ;;  %v209_v16 = vsel %vm193_vm1, %v192_v63, %v177_v18  ;;  %v1181_v17 = vpack.i.bf16 %v176_v10, %v161_v3  ;;  %vm469_vm6 = vcmask 785408  }
  0x72   :  { %v1186_v19 = vpack.i.bf16 %v209_v16, %v194_v15  ;;  %v1693_v22 = vsel %vm226_vm3, %v224_v21, %v225_v20  ;;  %v1699_v18 = vsel %vm226_vm3, %v225_v20, %v210_v25  ;;  %v215_v46 = vrot.slane %v1451_v12, 4 }
  0x73   :  { %1152 = vrot.lane.b32.xlu0 %v1151_v37, %s1329_s30  ;;  %v501_v23 = vpack.c.bf16 %v1699_v18, %v1693_v22  ;;  %v216_v57 = vrot.slane %v1453_v13, 4  ;;  %v1204_v22 = vld [vmem:[#allocation8 + $0x18] sm:$0xff]   ;;  %v1205_v18 = vld [vmem:[#allocation8 + $0x20] sm:$0xff]   ;;  %vm1339_vm7 = vmmov 0   ;;  %vm840_vm8 = vcmask 1041409  }
  0x74   :  { %1157 = vrot.lane.b32.xlu1 %v1156_v39, %s1337_s6  ;;  %v237_v3 = vsel %vm226_vm3, %v214_v44, %v215_v46  ;;  %v218_v44 = vrot.slane %v1518_v60, 4  ;;  %vm842_vm9 = vcmask 1042434   ;;  %vm844_vm10 = vcmask 1043459  }
  0x75   :  { %vm846_vm11 = vcmask 1044484   ;;  %vm848_vm12 = vcmask 1045509   ;;  %vm850_vm13 = vcmask 1046534   ;;  %vm852_vm14 = vcmask 1047559  }
  0x77   :  { %1162 = vrot.lane.b32.xlu0 %v1161_v55, %s1336_s3 }
  0x78   :  { %1167 = vrot.lane.b32.xlu1 %v1166_v56, %s1329_s30 }
  0x7b   :  { %1172 = vrot.lane.b32.xlu0 %v1171_v0, %s1337_s6 }
  0x7c   :  { %1177 = vrot.lane.b32.xlu1 %v1176_v4, %s1336_s3  ;;  %v236_v4 = vsel %vm226_vm3, %v215_v46, %v216_v57 }
  0x7f   :  { %1182 = vrot.lane.b32.xlu0 %v1181_v17, %s1329_s30 }
  0x80   :  { %1187 = vrot.lane.b32.xlu1 %v1186_v19, %s1337_s6  ;;  %v491_v19 = vpack.c.bf16 %v236_v4, %v237_v3 }
  0xc5   :  { %v1073_v24 = vpop.permute.xlu0 %1072 }
  0xc6   :  { %v1083_v27 = vpop.permute.xlu1 %1082  ;;  %v1075_v28 = vunpack.i.h.bf16 %v1073_v24  ;;  %v1074_v30 = vunpack.i.l.bf16 %v1073_v24 }
  0xc7   :  { %v1085_v31 = vunpack.i.h.bf16 %v1083_v27  ;;  %v1084_v32 = vunpack.i.l.bf16 %v1083_v27  ;;  %v217_v27 = vrot.slane %v1455_v14, 4 }
  0xc8   :  { %v437_v40 = vsel %vm435_vm4, %v1443_v7, %v1075_v28  ;;  %v436_v25 = vsel %vm435_vm4, %v1441_v6, %v1074_v30 }
  0xc9   :  { %v1078_v33 = vpop.permute.xlu0 %1077 }
  0xca   :  { %v1080_v36 = vunpack.i.h.bf16 %v1078_v33  ;;  %v1079_v37 = vunpack.i.l.bf16 %v1078_v33  ;;  %v1088_v39 = vpop.permute.xlu1 %1087 }
  0xcb   :  { %v1090_v41 = vunpack.i.h.bf16 %v1088_v39  ;;  %v1089_v42 = vunpack.i.l.bf16 %v1088_v39 }
  0xcc   :  { %v453_v43 = vsel %vm452_vm5, %v436_v25, %v1079_v37  ;;  %v454_v45 = vsel %vm452_vm5, %v437_v40, %v1080_v36  ;;  %v235_v37 = vsel %vm226_vm3, %v216_v57, %v217_v27 }
  0xcd   :  { %v439_v47 = vsel %vm435_vm4, %v1447_v9, %v1090_v41  ;;  %v438_v49 = vsel %vm435_vm4, %v1445_v8, %v1089_v42  ;;  %v1093_v50 = vpop.permute.xlu0 %1092  ;;  %v470_v7 = vsel %vm469_vm6, %v453_v43, %v1084_v32  ;;  %v471_v51 = vsel %vm469_vm6, %v454_v45, %v1085_v31 }
  0xce   :  { %v1095_v6 = vunpack.i.h.bf16 %v1093_v50  ;;  %v1094_v52 = vunpack.i.l.bf16 %v1093_v50  ;;  %v1098_v55 = vpop.permute.xlu1 %1097  ;;  %v486_v56 = vpack.c.bf16 %v471_v51, %v470_v7  ;;  %v219_v50 = vrot.slane %v1537_v26, 4 }
  0xcf   :  { %v1100_v58 = vunpack.i.h.bf16 %v1098_v55  ;;  %v1099_v59 = vunpack.i.l.bf16 %v1098_v55  ;;  %v220_v7 = vrot.slane %v1543_v29, 4 }
  0xd0   :  { %v456_v1 = vsel %vm452_vm5, %v439_v47, %v1095_v6  ;;  %v455_v9 = vsel %vm452_vm5, %v438_v49, %v1094_v52  ;;  %639 = vmatmul.mubr.bf16.vlgmr.msra.gmra.mrb[0].mxu0 %v486_v56 }
  0xd1   :  { %v1103_v62 = vpop.permute.xlu0 %1102  ;;  %973 = vmatprep.mubr.msk.bf16.mxu0 %vm435_vm4, %v489_v54  ;;  %v472_v10 = vsel %vm469_vm6, %v455_v9, %v1099_v59  ;;  %v473_v15 = vsel %vm469_vm6, %v456_v1, %v1100_v58  ;;  %v233_v58 = vsel %vm226_vm3, %v218_v44, %v219_v50 }
  0xd2   :  { %v1105_v8 = vunpack.i.h.bf16 %v1103_v62  ;;  %v1104_v63 = vunpack.i.l.bf16 %v1103_v62  ;;  %v1108_v0 = vpop.permute.xlu1 %1107  ;;  %v488_v20 = vpack.c.bf16 %v473_v15, %v472_v10  ;;  %v221_v15 = vrot.slane %v1551_v34, 4 }
  0xd3   :  { %v1110_v16 = vunpack.i.h.bf16 %v1108_v0  ;;  %v1109_v17 = vunpack.i.l.bf16 %v1108_v0 }
  0xd4   :  { %v441_v48 = vsel %vm435_vm4, %v1451_v12, %v1105_v8  ;;  %v440_v53 = vsel %vm435_vm4, %v1449_v11, %v1104_v63  ;;  %v234_v11 = vsel %vm226_vm3, %v217_v27, %v218_v44 }
  0xd5   :  { %v1113_v54 = vpop.permute.xlu0 %1112  ;;  %v457_v31 = vsel %vm452_vm5, %v440_v53, %v1109_v17  ;;  %v458_v32 = vsel %vm452_vm5, %v441_v48, %v1110_v16  ;;  %v493_v46 = vpack.c.bf16 %v234_v11, %v235_v37  ;;  %v222_v16 = vrot.slane %v1557_v38, 4 }
  0xd6   :  { %v1118_v24 = vpop.permute.xlu1 %1117  ;;  %v1115_v28 = vunpack.i.h.bf16 %v1113_v54  ;;  %v1114_v30 = vunpack.i.l.bf16 %v1113_v54  ;;  %v223_v37 = vrot.slane %v1585_v61, 4 }
  0xd7   :  { %v1120_v33 = vunpack.i.h.bf16 %v1118_v24  ;;  %v1119_v12 = vunpack.i.l.bf16 %v1118_v24  ;;  %v231_v24 = vsel %vm226_vm3, %v220_v7, %v221_v15 }
  0xd8   :  { %647 = vmatmul.mubr.bf16.gmra.mrb[4].mxu0 %v488_v20  ;;  %v474_v39 = vsel %vm469_vm6, %v457_v31, %v1114_v30  ;;  %v475_v40 = vsel %vm469_vm6, %v458_v32, %v1115_v28 }
  0xd9   :  { %v1123_v36 = vpop.permute.xlu0 %1122  ;;  %974 = vmatprep.mubr.msk.bf16.mxu0 %vm435_vm4, %v491_v19  ;;  %v443_v43 = vsel %vm435_vm4, %v1455_v14, %v1120_v33  ;;  %v442_v45 = vsel %vm435_vm4, %v1453_v13, %v1119_v12  ;;  %v490_v47 = vpack.c.bf16 %v475_v40, %v474_v39  ;;  %v232_v13 = vsel %vm226_vm3, %v219_v50, %v220_v7 }
  0xda   :  { %v1125_v25 = vunpack.i.h.bf16 %v1123_v36  ;;  %v1124_v41 = vunpack.i.l.bf16 %v1123_v36  ;;  %v1128_v42 = vpop.permute.xlu1 %1127  ;;  %v495_v4 = vpack.c.bf16 %v232_v13, %v233_v58 }
  0xdb   :  { %v1130_v51 = vunpack.i.h.bf16 %v1128_v42  ;;  %v1129_v6 = vunpack.i.l.bf16 %v1128_v42 }
  0xdc   :  { %v460_v52 = vsel %vm452_vm5, %v443_v43, %v1125_v25  ;;  %v459_v55 = vsel %vm452_vm5, %v442_v45, %v1124_v41 }
  0xdd   :  { %v1133_v49 = vpop.permute.xlu0 %1132  ;;  %v476_v59 = vsel %vm469_vm6, %v459_v55, %v1129_v6  ;;  %v477_v1 = vsel %vm469_vm6, %v460_v52, %v1130_v51 }
  0xde   :  { %v1138_v56 = vpop.permute.xlu1 %1137  ;;  %v1135_v57 = vunpack.i.h.bf16 %v1133_v49  ;;  %v1134_v14 = vunpack.i.l.bf16 %v1133_v49  ;;  %v492_v3 = vpack.c.bf16 %v477_v1, %v476_v59 }
  0xdf   :  { %v1140_v9 = vunpack.i.h.bf16 %v1138_v56  ;;  %v1139_v62 = vunpack.i.l.bf16 %v1138_v56 }
  0xe0   :  { %655 = vmatmul.mubr.bf16.gmra.mrb[8].mxu0 %v490_v47  ;;  %v445_v63 = vsel %vm435_vm4, %v1537_v26, %v1135_v57  ;;  %v444_v0 = vsel %vm435_vm4, %v1518_v60, %v1134_v14  ;;  %v230_v60 = vsel %vm226_vm3, %v221_v15, %v222_v16 }
  0xe1   :  { %975 = vmatprep.mubr.msk.bf16.mxu0 %vm435_vm4, %v493_v46  ;;  %v1143_v8 = vpop.permute.xlu0 %1142  ;;  %v461_v53 = vsel %vm452_vm5, %v444_v0, %v1139_v62  ;;  %v462_v54 = vsel %vm452_vm5, %v445_v63, %v1140_v9  ;;  %v497_v12 = vpack.c.bf16 %v230_v60, %v231_v24  ;;  %v1815_v24 = vld [vmem:[#allocation7 + $0x8] sm:$0xff] }
  0xe2   :  { %v1148_v10 = vpop.permute.xlu1 %1147  ;;  %v1145_v17 = vunpack.i.h.bf16 %v1143_v8  ;;  %v1144_v48 = vunpack.i.l.bf16 %v1143_v8 }
  0xe3   :  { %v1150_v20 = vunpack.i.h.bf16 %v1148_v10  ;;  %v1149_v26 = vunpack.i.l.bf16 %v1148_v10 }
  0xe4   :  { %v478_v27 = vsel %vm469_vm6, %v461_v53, %v1144_v48  ;;  %v479_v44 = vsel %vm469_vm6, %v462_v54, %v1145_v17  ;;  %v1338_v48 = vmov 0.0   ;;  %v1202_v53 = vld [vmem:[#allocation8 + $0x8] sm:$0xff]   ;;  %v1203_v54 = vld [vmem:[#allocation8 + $0x10] sm:$0xff]  }
  0xe5   :  { %v1153_v19 = vpop.permute.xlu0 %1152  ;;  %v447_v32 = vsel %vm435_vm4, %v1551_v34, %v1150_v20  ;;  %v446_v33 = vsel %vm435_vm4, %v1543_v29, %v1149_v26  ;;  %v494_v36 = vpack.c.bf16 %v479_v44, %v478_v27  ;;  %v228_v29 = vsel %vm226_vm3, %v223_v37, %v224_v21  ;;  %1037 = vmatprep.subr.bf16.mxu1 %v1338_v48  ;;  %v1208_v20 = vld [vmem:[#allocation8 + $0x38] sm:$0xff]   ;;  %v1813_v26 = vld [vmem:[#allocation7] sm:$0xff] }
  0xe6   :  { %v1155_v28 = vunpack.i.h.bf16 %v1153_v19  ;;  %v1154_v30 = vunpack.i.l.bf16 %v1153_v19  ;;  %v1158_v31 = vpop.permute.xlu1 %1157  ;;  %v229_v34 = vsel %vm226_vm3, %v222_v16, %v223_v37  ;;  %v1207_v19 = vld [vmem:[#allocation8 + $0x30] sm:$0xff]   ;;  %1053 = vmatprep.mubr.msk.bf16.mxu1 %vm1339_vm7, %v1338_v48 }
  0xe7   :  { %v1160_v39 = vunpack.i.h.bf16 %v1158_v31  ;;  %v1159_v40 = vunpack.i.l.bf16 %v1158_v31  ;;  %v499_v52 = vpack.c.bf16 %v228_v29, %v229_v34 }
  0xe8   :  { %663 = vmatmul.mubr.bf16.gmra.mrb[12].mxu0 %v492_v3  ;;  %v464_v25 = vsel %vm452_vm5, %v447_v32, %v1155_v28  ;;  %v463_v41 = vsel %vm452_vm5, %v446_v33, %v1154_v30 }
  0xe9   :  { %976 = vmatprep.mubr.msk.bf16.mxu0 %vm435_vm4, %v495_v4  ;;  %v1163_v11 = vpop.permute.xlu0 %1162  ;;  %v480_v46 = vsel %vm469_vm6, %v463_v41, %v1159_v40  ;;  %v481_v47 = vsel %vm469_vm6, %v464_v25, %v1160_v39 }
  0xea   :  { %v1168_v42 = vpop.permute.xlu1 %1167  ;;  %v1165_v43 = vunpack.i.h.bf16 %v1163_v11  ;;  %v1164_v45 = vunpack.i.l.bf16 %v1163_v11  ;;  %v496_v55 = vpack.c.bf16 %v481_v47, %v480_v46 }
  0xeb   :  { %v1170_v49 = vunpack.i.h.bf16 %v1168_v42  ;;  %v1169_v50 = vunpack.i.l.bf16 %v1168_v42 }
  0xec   :  { %v449_v51 = vsel %vm435_vm4, %v1585_v61, %v1165_v43  ;;  %v448_v6 = vsel %vm435_vm4, %v1557_v38, %v1164_v45 }
  0xed   :  { %v1173_v7 = vpop.permute.xlu0 %1172  ;;  %v465_v2 = vsel %vm452_vm5, %v448_v6, %v1169_v50  ;;  %v466_v14 = vsel %vm452_vm5, %v449_v51, %v1170_v49 }
  0xee   :  { %v1178_v56 = vpop.permute.xlu1 %1177  ;;  %v1175_v21 = vunpack.i.h.bf16 %v1173_v7  ;;  %v1174_v57 = vunpack.i.l.bf16 %v1173_v7 }
  0xef   :  { %v1180_v13 = vunpack.i.h.bf16 %v1178_v56  ;;  %v1179_v58 = vunpack.i.l.bf16 %v1178_v56 }
  0xf0   :  { %671 = vmatmul.mubr.bf16.gmra.mrb[16].mxu0 %v494_v36  ;;  %v482_v61 = vsel %vm469_vm6, %v465_v2, %v1174_v57  ;;  %v483_v1 = vsel %vm469_vm6, %v466_v14, %v1175_v21 }
  0xf1   :  { %977 = vmatprep.mubr.msk.bf16.mxu0 %vm435_vm4, %v497_v12  ;;  %v1183_v59 = vpop.permute.xlu0 %1182  ;;  %v451_v8 = vsel %vm435_vm4, %v1618_v35, %v1180_v13  ;;  %v450_v63 = vsel %vm435_vm4, %v1596_v5, %v1179_v58  ;;  %v498_v0 = vpack.c.bf16 %v483_v1, %v482_v61  ;;  %v1201_v5 = vld [vmem:[#allocation8] sm:$0xff]  }
  0xf2   :  { %v1185_v38 = vunpack.i.h.bf16 %v1183_v59  ;;  %v1184_v9 = vunpack.i.l.bf16 %v1183_v59  ;;  %v1188_v62 = vpop.permute.xlu1 %1187  ;;  %1038 = vmatpush3.bf16.msra.mxu1 %v1201_v5 }
  0xf3   :  { %v1190_v4 = vunpack.i.h.bf16 %v1188_v62  ;;  %v1189_v3 = vunpack.i.l.bf16 %v1188_v62  ;;  %1039 = vmatprep.subr.bf16.mxu1 %v1338_v48 }
  0xf4   :  { %v468_v10 = vsel %vm452_vm5, %v451_v8, %v1185_v38  ;;  %v467_v15 = vsel %vm452_vm5, %v450_v63, %v1184_v9 }
  0xf5   :  { %v484_v16 = vsel %vm469_vm6, %v467_v15, %v1189_v3  ;;  %v485_v35 = vsel %vm469_vm6, %v468_v10, %v1190_v4 }
  0xf6   :  { %v500_v17 = vpack.c.bf16 %v485_v35, %v484_v16  ;;  %1040 = vmatpush3.bf16.msra.mxu1 %v1202_v53 }
  0xf7   :  { %1041 = vmatprep.subr.bf16.mxu1 %v1338_v48 }
  0xf8   :  { %679 = vmatmul.mubr.bf16.gmra.mrb[20].mxu0 %v496_v55 }
  0xf9   :  { %978 = vmatprep.mubr.msk.bf16.mxu0 %vm435_vm4, %v499_v52 }
  0xfa   :  { %1042 = vmatpush3.bf16.msra.mxu1 %v1203_v54 }
  0xfb   :  { %1043 = vmatprep.subr.bf16.mxu1 %v1338_v48 }
  0xfe   :  { %1044 = vmatpush3.bf16.msra.mxu1 %v1204_v22 }
  0xff   :  { %1045 = vmatprep.subr.bf16.mxu1 %v1338_v48 }
 0x100   :  { %687 = vmatmul.mubr.bf16.gmra.mrb[24].mxu0 %v498_v0 }
 0x101   :  { %979 = vmatprep.mubr.msk.bf16.mxu0 %vm435_vm4, %v501_v23  ;;  %v1206_v23 = vld [vmem:[#allocation8 + $0x28] sm:$0xff]  }
 0x102   :  { %1046 = vmatpush3.bf16.msra.mxu1 %v1205_v18 }
 0x103   :  { %1047 = vmatprep.subr.bf16.mxu1 %v1338_v48 }
 0x106   :  { %1048 = vmatpush3.bf16.msra.mxu1 %v1206_v23 }
 0x107   :  { %1049 = vmatprep.subr.bf16.mxu1 %v1338_v48 }
 0x108   :  { %695 = vmatmul.mubr.bf16.gmra.mrb[28].mxu0 %v500_v17 }
 0x10a   :  { %1050 = vmatpush3.bf16.msra.mxu1 %v1207_v19 }
 0x10b   :  { %1051 = vmatprep.subr.bf16.mxu1 %v1338_v48 }
 0x10e   :  { %1052 = vmatpush3.bf16.msra.mxu1 %v1208_v20 }
 0x1a3   :  { %v640_v60 = vpop.f32.mrb[0].mxu0 }
 0x1a4   :  { %v705_v27 = vadd.f32 %v1813_v26, %v640_v60  ;;  %v642_v44 = vpop.f32.mrb[1].mxu0 }
 0x1a5   :  { %v643_v28 = vpop.f32.mrb[2].mxu0 }
 0x1a6   :  { %v706_v30 = vadd.f32 %v1815_v24, %v643_v28  ;;  %v645_v31 = vpop.f32.mrb[3].mxu0  ;;  %v721_v32 = vmax.f32 %v705_v27, 0.0 }
 0x1a8   :  { %v722_v33 = vmax.f32 %v706_v30, 0.0 }
 0x1aa   :  { %v737_v12 = vmax.f32 %v721_v32, %v722_v33 }
 0x1ab   :  { %v648_v36 = vpop.f32.mrb[4].mxu0 }
 0x1ac   :  { %v738_v11 = vrot.slane %v737_v12, 4  ;;  %v707_v37 = vadd.f32 %v1813_v26, %v648_v36  ;;  %v650_v39 = vpop.f32.mrb[5].mxu0 }
 0x1ad   :  { %v651_v40 = vpop.f32.mrb[6].mxu0 }
 0x1ae   :  { %v739_v25 = vmax.f32 %v737_v12, %v738_v11  ;;  %v708_v41 = vadd.f32 %v1815_v24, %v651_v40  ;;  %v653_v42 = vpop.f32.mrb[7].mxu0  ;;  %v723_v45 = vmax.f32 %v707_v37, 0.0 }
 0x1b0   :  { %v740_v43 = vrot.slane %v739_v25, 2  ;;  %v724_v29 = vmax.f32 %v708_v41, 0.0 }
 0x1b2   :  { %v741_v34 = vmax.f32 %v739_v25, %v740_v43  ;;  %v744_v46 = vmax.f32 %v723_v45, %v724_v29 }
 0x1b3   :  { %v656_v47 = vpop.f32.mrb[8].mxu0 }
 0x1b4   :  { %v745_v49 = vrot.slane %v744_v46, 4  ;;  %v709_v50 = vadd.f32 %v1813_v26, %v656_v47  ;;  %v658_v7 = vpop.f32.mrb[9].mxu0  ;;  %v742_v6 = vrot.slane %v741_v34, 1 }
 0x1b5   :  { %v659_v51 = vpop.f32.mrb[10].mxu0 }
 0x1b6   :  { %v746_v52 = vmax.f32 %v744_v46, %v745_v49  ;;  %v710_v55 = vadd.f32 %v1815_v24, %v659_v51  ;;  %v661_v56 = vpop.f32.mrb[11].mxu0  ;;  %v725_v57 = vmax.f32 %v709_v50, 0.0  ;;  %v743_v14 = vmax.f32 %v741_v34, %v742_v6 }
 0x1b8   :  { %v747_v21 = vrot.slane %v746_v52, 2  ;;  %v726_v2 = vmax.f32 %v710_v55, 0.0  ;;  %v793_v8 = vpack.c.bf16 %v743_v14, %v743_v14 }
 0x1ba   :  { %v748_v13 = vmax.f32 %v746_v52, %v747_v21  ;;  %v751_v58 = vmax.f32 %v725_v57, %v726_v2  ;;  %v832_v17 = vunpack.c.l.b16 %v793_v8 }
 0x1bb   :  { %v664_v59 = vpop.f32.mrb[12].mxu0 }
 0x1bc   :  { %v749_v61 = vrot.slane %v748_v13, 1  ;;  %v752_v1 = vrot.slane %v751_v58, 4  ;;  %v711_v38 = vadd.f32 %v1813_v26, %v664_v59  ;;  %v666_v9 = vpop.f32.mrb[13].mxu0 }
 0x1bd   :  { %v667_v62 = vpop.f32.mrb[14].mxu0 }
 0x1be   :  { %v750_v63 = vmax.f32 %v748_v13, %v749_v61  ;;  %v753_v0 = vmax.f32 %v751_v58, %v752_v1  ;;  %v712_v4 = vadd.f32 %v1815_v24, %v667_v62  ;;  %v669_v3 = vpop.f32.mrb[15].mxu0  ;;  %v727_v16 = vmax.f32 %v711_v38, 0.0 }
 0x1c0   :  { %v794_v10 = vpack.c.bf16 %v750_v63, %v750_v63  ;;  %v754_v15 = vrot.slane %v753_v0, 2  ;;  %v728_v35 = vmax.f32 %v712_v4, 0.0 }
 0x1c2   :  { %v833_v5 = vunpack.c.l.b16 %v794_v10  ;;  %v755_v48 = vmax.f32 %v753_v0, %v754_v15  ;;  %v758_v53 = vmax.f32 %v727_v16, %v728_v35 }
 0x1c3   :  { %v672_v54 = vpop.f32.mrb[16].mxu0 }
 0x1c4   :  { %v841_v22 = vsel %vm840_vm8, %v833_v5, %v832_v17  ;;  %v756_v18 = vrot.slane %v755_v48, 1  ;;  %v759_v23 = vrot.slane %v758_v53, 4  ;;  %v713_v19 = vadd.f32 %v1813_v26, %v672_v54  ;;  %v674_v20 = vpop.f32.mrb[17].mxu0 }
 0x1c5   :  { %v675_v60 = vpop.f32.mrb[18].mxu0 }
 0x1c6   :  { %v757_v27 = vmax.f32 %v755_v48, %v756_v18  ;;  %v760_v44 = vmax.f32 %v758_v53, %v759_v23  ;;  %v714_v28 = vadd.f32 %v1815_v24, %v675_v60  ;;  %v677_v30 = vpop.f32.mrb[19].mxu0  ;;  %v729_v33 = vmax.f32 %v713_v19, 0.0 }
 0x1c8   :  { %v795_v31 = vpack.c.bf16 %v757_v27, %v757_v27  ;;  %v761_v32 = vrot.slane %v760_v44, 2  ;;  %v730_v12 = vmax.f32 %v714_v28, 0.0 }
 0x1ca   :  { %v834_v36 = vunpack.c.l.b16 %v795_v31  ;;  %v762_v11 = vmax.f32 %v760_v44, %v761_v32  ;;  %v765_v37 = vmax.f32 %v729_v33, %v730_v12 }
 0x1cb   :  { %v680_v39 = vpop.f32.mrb[20].mxu0 }
 0x1cc   :  { %v843_v40 = vsel %vm842_vm9, %v834_v36, %v841_v22  ;;  %v763_v25 = vrot.slane %v762_v11, 1  ;;  %v766_v41 = vrot.slane %v765_v37, 4  ;;  %v715_v42 = vadd.f32 %v1813_v26, %v680_v39  ;;  %v682_v43 = vpop.f32.mrb[21].mxu0 }
 0x1cd   :  { %v683_v45 = vpop.f32.mrb[22].mxu0 }
 0x1ce   :  { %v764_v29 = vmax.f32 %v762_v11, %v763_v25  ;;  %v767_v34 = vmax.f32 %v765_v37, %v766_v41  ;;  %v716_v46 = vadd.f32 %v1815_v24, %v683_v45  ;;  %v685_v47 = vpop.f32.mrb[23].mxu0  ;;  %v731_v7 = vmax.f32 %v715_v42, 0.0  ;;  %v980_v45 = vld [vmem:[%s1852_s4] ss:$0 sm:$0xff] }
 0x1d0   :  { %v796_v49 = vpack.c.bf16 %v764_v29, %v764_v29  ;;  %v768_v50 = vrot.slane %v767_v34, 2  ;;  %v732_v51 = vmax.f32 %v716_v46, 0.0 }
 0x1d2   :  { %v835_v6 = vunpack.c.l.b16 %v796_v49  ;;  %v769_v52 = vmax.f32 %v767_v34, %v768_v50  ;;  %v772_v55 = vmax.f32 %v731_v7, %v732_v51 }
 0x1d3   :  { %v688_v56 = vpop.f32.mrb[24].mxu0 }
 0x1d4   :  { %v770_v21 = vrot.slane %v769_v52, 1  ;;  %v773_v57 = vrot.slane %v772_v55, 4  ;;  %v717_v2 = vadd.f32 %v1813_v26, %v688_v56  ;;  %v690_v14 = vpop.f32.mrb[25].mxu0  ;;  %v845_v13 = vsel %vm844_vm10, %v835_v6, %v843_v40 }
 0x1d5   :  { %v691_v58 = vpop.f32.mrb[26].mxu0 }
 0x1d6   :  { %v771_v59 = vmax.f32 %v769_v52, %v770_v21  ;;  %v774_v61 = vmax.f32 %v772_v55, %v773_v57  ;;  %v718_v1 = vadd.f32 %v1815_v24, %v691_v58  ;;  %v693_v38 = vpop.f32.mrb[27].mxu0  ;;  %v733_v8 = vmax.f32 %v717_v2, 0.0 }
 0x1d8   :  { %v797_v9 = vpack.c.bf16 %v771_v59, %v771_v59  ;;  %v775_v62 = vrot.slane %v774_v61, 2  ;;  %v734_v63 = vmax.f32 %v718_v1, 0.0 }
 0x1da   :  { %v836_v0 = vunpack.c.l.b16 %v797_v9  ;;  %v776_v4 = vmax.f32 %v774_v61, %v775_v62  ;;  %v779_v3 = vmax.f32 %v733_v8, %v734_v63 }
 0x1db   :  { %v696_v10 = vpop.f32.mrb[28].mxu0 }
 0x1dc   :  { %v777_v15 = vrot.slane %v776_v4, 1  ;;  %v780_v16 = vrot.slane %v779_v3, 4  ;;  %v719_v35 = vadd.f32 %v1813_v26, %v696_v10  ;;  %v698_v17 = vpop.f32.mrb[29].mxu0  ;;  %v847_v5 = vsel %vm846_vm11, %v836_v0, %v845_v13 }
 0x1dd   :  { %v699_v48 = vpop.f32.mrb[30].mxu0 }
 0x1de   :  { %v778_v53 = vmax.f32 %v776_v4, %v777_v15  ;;  %v781_v54 = vmax.f32 %v779_v3, %v780_v16  ;;  %v720_v22 = vadd.f32 %v1815_v24, %v699_v48  ;;  %v701_v18 = vpop.f32.mrb[31].mxu0  ;;  %v735_v20 = vmax.f32 %v719_v35, 0.0 }
 0x1e0   :  { %v798_v23 = vpack.c.bf16 %v778_v53, %v778_v53  ;;  %v782_v19 = vrot.slane %v781_v54, 2  ;;  %v736_v60 = vmax.f32 %v720_v22, 0.0 }
 0x1e2   :  { %v837_v27 = vunpack.c.l.b16 %v798_v23  ;;  %v783_v44 = vmax.f32 %v781_v54, %v782_v19  ;;  %v786_v28 = vmax.f32 %v735_v20, %v736_v60 }
 0x1e4   :  { %v784_v30 = vrot.slane %v783_v44, 1  ;;  %v787_v31 = vrot.slane %v786_v28, 4  ;;  %v849_v32 = vsel %vm848_vm12, %v837_v27, %v847_v5 }
 0x1e6   :  { %v785_v26 = vmax.f32 %v783_v44, %v784_v30  ;;  %v788_v33 = vmax.f32 %v786_v28, %v787_v31 }
 0x1e8   :  { %v799_v12 = vpack.c.bf16 %v785_v26, %v785_v26  ;;  %v789_v36 = vrot.slane %v788_v33, 2 }
 0x1ea   :  { %v838_v11 = vunpack.c.l.b16 %v799_v12  ;;  %v790_v37 = vmax.f32 %v788_v33, %v789_v36 }
 0x1ec   :  { %v791_v24 = vrot.slane %v790_v37, 1  ;;  %v851_v39 = vsel %vm850_vm13, %v838_v11, %v849_v32 }
 0x1ee   :  { %v792_v40 = vmax.f32 %v790_v37, %v791_v24 }
 0x1f0   :  { %v800_v25 = vpack.c.bf16 %v792_v40, %v792_v40 }
 0x1f2   :  { %v839_v41 = vunpack.c.l.b16 %v800_v25 }
 0x1f4   :  { %v853_v42 = vsel %vm852_vm14, %v839_v41, %v851_v39 }
 0x1f5   :  { %v854_v43 = vpack.c.b16 %v853_v42, %v853_v42 }
 0x1f7   :  { %1054 = vmatmul.mubr.bf16.vlgmr.msra.gmra.mrb[0].mxu1 %v854_v43 }
 0x2ca   :  { %v938_v29 = vpop.f32.mrb[0].mxu1 }
 0x2cb   :  { %v939_v34 = vadd.f32 %v980_v45, %v938_v29  ;;  %v1055_v46 = vpop.f32.mrb[1].mxu1 }
 0x2cc   :  { %v941_v47 = vpop.f32.mrb[2].mxu1 }
 0x2cd   :  { %944 = vst [vmem:[#allocation10] sm:$0xff] %v939_v34  ;;  %v1056_v49 = vpop.f32.mrb[3].mxu1 }
 0x2ce   :  { %1308 = shalt.err (!%p1305_p8)
}
 0x2cf   :  { %s1309_s4 = scalar_lea.hbm %s1853_s5, 128 }
 0x2d0   :  { %p1310_p9 = scmp.ne.s32.totalorder %s1853_s5, %s1309_s4  ;;  %p1313_p10 = scmp.lt.u32.totalorder %s1309_s4, %s1853_s5 }
 0x2d2   :  { %p1315_p11 = pnand %p1313_p10, %p1310_p9 }
 0x2d4   :  { %1318 = shalt.err (!%p1315_p11)
}
 0x2d5   :  { %954 = dma.vmem_to_hbm [thread:$0]  %s952_s20, 128, %s1853_s5, [#allocation4]  }
 0x2d6   :  { %1325 = dma.done.wait [#allocation4], 128  }
 0x2d7   :  { %1326 = vsyncadd [#allocation4], 4294967168 }
 0x2d8   :  { %958 = vsyncpa [#allocation3], 1 }
 0x2d9   :  { %959 = vsyncpa [#allocation6], 1 }
 0x2da   :  { %960 = vsyncpa [#allocation9], 1 }
 0x2db   :  { %961 = vsyncpa [#allocation4], 1 }

</bundles_post_ra>
